<compile_context>
chip_gen: v5e
topology: v5e:2x2
jax: 0.10.0
libtpu: 0.0.40
codegen_flags: <defaults>
</compile_context>

<pallas_src>
import functools

import jax
import jax.numpy as jnp
from jax.experimental import pallas as pl
from jax.experimental.pallas import tpu as pltpu


def mlp_kernel(x_ref, w1_ref, b1_ref, w2_ref, b2_ref, w3_ref, b3_ref, o_ref):
    # Layer 1: Linear(input_dim, hidden) + ReLU  (bf16 MXU matmul, f32 accumulation)
    h1 = jnp.dot(x_ref[...], w1_ref[...], preferred_element_type=jnp.float32)
    h1 = jnp.maximum(h1 + b1_ref[...], 0.0)
    # Layer 2: Linear(hidden, hidden) + ReLU
    h2 = jnp.dot(h1.astype(w2_ref.dtype), w2_ref[...], preferred_element_type=jnp.float32)
    h2 = jnp.maximum(h2 + b2_ref[...], 0.0)
    # Layer 3: Linear(hidden, out_pad) (logits, zero-padded columns; no activation)
    logits = jnp.dot(h2.astype(w3_ref.dtype), w3_ref[...], preferred_element_type=jnp.float32)
    o_ref[...] = (logits + b3_ref[...]).astype(o_ref.dtype)


@functools.partial(jax.jit, static_argnames=("tb",))
def mlp_forward(x_flat, w1, b1, w2, b2, w3, b3, *, tb=128):
    """x_flat: (B, input_dim). Weights are (in, out); biases are (1, out). Returns (B, out) f32."""
    B, input_dim = x_flat.shape
    hidden_dim = w1.shape[1]
    out_dim = w3.shape[1]

    # Lane-dense final layer: zero-pad out_dim -> multiple of 128.
    out_pad = ((out_dim + 127) // 128) * 128
    w3p = jnp.zeros((hidden_dim, out_pad), w3.dtype).at[:, :out_dim].set(w3)
    b3p = jnp.zeros((1, out_pad), b3.dtype).at[:, :out_dim].set(b3)

    # Pad batch up to a whole number of TB-row tiles.
    n_tiles = pl.cdiv(B, tb)
    Bp = n_tiles * tb
    if Bp != B:
        x_flat = jnp.pad(x_flat, ((0, Bp - B), (0, 0)))

    # bf16 compute path (f32 accumulation inside the kernel), f32 biases.
    compute_dtype = jnp.bfloat16
    xc = x_flat.astype(compute_dtype)
    w1c = w1.astype(compute_dtype)
    w2c = w2.astype(compute_dtype)
    w3c = w3p.astype(compute_dtype)
    b1f = b1.astype(jnp.float32)
    b2f = b2.astype(jnp.float32)
    b3f = b3p.astype(jnp.float32)

    def const_spec(shape):
        return pl.BlockSpec(shape, lambda i: (0, 0))  # fetched once, VMEM-resident

    out = pl.pallas_call(
        mlp_kernel,
        out_shape=jax.ShapeDtypeStruct((Bp, out_pad), jnp.float32),
        grid=(n_tiles,),
        in_specs=[
            pl.BlockSpec((tb, input_dim), lambda i: (i, 0)),   # activation tile, pipelined
            const_spec((input_dim, hidden_dim)),               # w1
            const_spec((1, hidden_dim)),                       # b1
            const_spec((hidden_dim, hidden_dim)),              # w2
            const_spec((1, hidden_dim)),                       # b2
            const_spec((hidden_dim, out_pad)),                 # w3 (padded)
            const_spec((1, out_pad)),                          # b3 (padded)
        ],
        out_specs=pl.BlockSpec((tb, out_pad), lambda i: (i, 0)),
        compiler_params=pltpu.CompilerParams(
            dimension_semantics=("parallel",),          # shard batch tiles across TCs (v7x)
            vmem_limit_bytes=32 * 1024 * 1024,          # explicit; fits v7x 64 MiB/TC w/ 2x buffering
        ),
    )(xc, w1c, b1f, w2c, b2f, w3c, b3f)

    return out[:B, :out_dim]


def init_params(key, input_dim, hidden_dim, out_dim=2):
    """Deterministic init mimicking PyTorch Linear default (uniform +-1/sqrt(fan_in))."""
    ks = jax.random.split(key, 6)

    def uniform(k, shape, fan_in):
        bound = 1.0 / jnp.sqrt(jnp.float32(fan_in))
        return jax.random.uniform(k, shape, jnp.float32, -bound, bound)

    w1 = uniform(ks[0], (input_dim, hidden_dim), input_dim)
    b1 = uniform(ks[1], (1, hidden_dim), input_dim)
    w2 = uniform(ks[2], (hidden_dim, hidden_dim), hidden_dim)
    b2 = uniform(ks[3], (1, hidden_dim), hidden_dim)
    w3 = uniform(ks[4], (hidden_dim, out_dim), hidden_dim)
    b3 = uniform(ks[5], (1, out_dim), hidden_dim)
    return w1, b1, w2, b2, w3, b3


def ref_forward(x_flat, params):
    """Plain-JAX reference emulating the kernel's bf16-rounded operands with f32 math."""
    w1, b1, w2, b2, w3, b3 = params
    rb = lambda a: a.astype(jnp.bfloat16).astype(jnp.float32)
    h1 = jnp.maximum(rb(x_flat) @ rb(w1) + b1, 0.0)
    h2 = jnp.maximum(rb(h1) @ rb(w2) + b2, 0.0)
    return rb(h2) @ rb(w3) + b3


if __name__ == "__main__":
    key = jax.random.PRNGKey(0)
    k_x, k_p = jax.random.split(key)

    # Small NCHW input: batch=8, channels=4, spatial=8x8 -> input_dim = 4*8*8 = 256
    B, C, H, W = 8, 4, 8, 8
    input_dim = C * H * W
    hidden_dim = 128  # constructor arg of MyModel (default 512; small value for a small test)

    x = jax.random.normal(k_x, (B, C, H, W), jnp.float32)
    params = init_params(k_p, input_dim, hidden_dim)

    # Flatten (glue, plain JAX) — identical semantics to torch.nn.Flatten on NCHW
    x_flat = x.reshape(B, -1)

    logits = mlp_forward(x_flat, *params)
    logits = jax.block_until_ready(logits)

    ref = ref_forward(x_flat, params)
    assert logits.shape == (B, 2), logits.shape
    assert jnp.allclose(logits, ref, atol=5e-3, rtol=5e-3), float(jnp.max(jnp.abs(logits - ref)))

    print("KERNEL_OK")
</pallas_src>

<mosaic_0001>
module attributes {stable_mosaic.version = 11 : i64} {
  func.func @mlp_kernel(%arg0: i32, %arg1: memref<128x256xbf16, #tpu.memory_space<vmem>>, %arg2: memref<256x128xbf16, #tpu.memory_space<vmem>>, %arg3: memref<1x128xf32, #tpu.memory_space<vmem>>, %arg4: memref<128x128xbf16, #tpu.memory_space<vmem>>, %arg5: memref<1x128xf32, #tpu.memory_space<vmem>>, %arg6: memref<128x128xbf16, #tpu.memory_space<vmem>>, %arg7: memref<1x128xf32, #tpu.memory_space<vmem>>, %arg8: memref<128x128xf32, #tpu.memory_space<vmem>>) attributes {dimension_semantics = [#tpu.dimension_semantics<parallel>], iteration_bounds = array<i64: 1>, scalar_prefetch = 0 : i64, scratch_operands = 0 : i64, tpu.core_type = #tpu.core_type<tc>, window_params = [{transform_indices = @transform_0, window_bounds = array<i64: 128, 256>}, {pipeline_mode = #tpu.pipeline_mode<synchronous>, transform_indices = @transform_1, window_bounds = array<i64: 256, 128>}, {pipeline_mode = #tpu.pipeline_mode<synchronous>, transform_indices = @transform_2, window_bounds = array<i64: 1, 128>}, {pipeline_mode = #tpu.pipeline_mode<synchronous>, transform_indices = @transform_3, window_bounds = array<i64: 128, 128>}, {pipeline_mode = #tpu.pipeline_mode<synchronous>, transform_indices = @transform_4, window_bounds = array<i64: 1, 128>}, {pipeline_mode = #tpu.pipeline_mode<synchronous>, transform_indices = @transform_5, window_bounds = array<i64: 128, 128>}, {pipeline_mode = #tpu.pipeline_mode<synchronous>, transform_indices = @transform_6, window_bounds = array<i64: 1, 128>}, {transform_indices = @transform_7, window_bounds = array<i64: 128, 128>}]} {
    %c0 = arith.constant 0 : index
    %c0_0 = arith.constant 0 : index
    %0 = vector.load %arg1[%c0, %c0_0] : memref<128x256xbf16, #tpu.memory_space<vmem>>, vector<128x256xbf16>
    %c0_1 = arith.constant 0 : index
    %c0_2 = arith.constant 0 : index
    %1 = vector.load %arg2[%c0_1, %c0_2] : memref<256x128xbf16, #tpu.memory_space<vmem>>, vector<256x128xbf16>
    %cst = arith.constant dense<0.000000e+00> : vector<128x128xf32>
    %2 = tpu.matmul %0, %1, %cst {dimension_numbers = #tpu.dot_dimension_numbers<[1], [0], [0], [1], [0, 0, 1, 1], [], []>} : vector<128x256xbf16>, vector<256x128xbf16>, vector<128x128xf32> -> vector<128x128xf32>
    %c0_3 = arith.constant 0 : index
    %c0_4 = arith.constant 0 : index
    %3 = vector.load %arg3[%c0_3, %c0_4] : memref<1x128xf32, #tpu.memory_space<vmem>>, vector<1x128xf32>
    %4 = vector.broadcast %3 : vector<1x128xf32> to vector<128x128xf32>
    %5 = arith.addf %2, %4 : vector<128x128xf32>
    %cst_5 = arith.constant 0.000000e+00 : f32
    %6 = vector.broadcast %cst_5 : f32 to vector<128x128xf32>
    %7 = arith.maximumf %5, %6 : vector<128x128xf32>
    %8 = arith.truncf %7 : vector<128x128xf32> to vector<128x128xbf16>
    %c0_6 = arith.constant 0 : index
    %c0_7 = arith.constant 0 : index
    %9 = vector.load %arg4[%c0_6, %c0_7] : memref<128x128xbf16, #tpu.memory_space<vmem>>, vector<128x128xbf16>
    %cst_8 = arith.constant dense<0.000000e+00> : vector<128x128xf32>
    %10 = tpu.matmul %8, %9, %cst_8 {dimension_numbers = #tpu.dot_dimension_numbers<[1], [0], [0], [1], [0, 0, 1, 1], [], []>} : vector<128x128xbf16>, vector<128x128xbf16>, vector<128x128xf32> -> vector<128x128xf32>
    %c0_9 = arith.constant 0 : index
    %c0_10 = arith.constant 0 : index
    %11 = vector.load %arg5[%c0_9, %c0_10] : memref<1x128xf32, #tpu.memory_space<vmem>>, vector<1x128xf32>
    %12 = vector.broadcast %11 : vector<1x128xf32> to vector<128x128xf32>
    %13 = arith.addf %10, %12 : vector<128x128xf32>
    %cst_11 = arith.constant 0.000000e+00 : f32
    %14 = vector.broadcast %cst_11 : f32 to vector<128x128xf32>
    %15 = arith.maximumf %13, %14 : vector<128x128xf32>
    %16 = arith.truncf %15 : vector<128x128xf32> to vector<128x128xbf16>
    %c0_12 = arith.constant 0 : index
    %c0_13 = arith.constant 0 : index
    %17 = vector.load %arg6[%c0_12, %c0_13] : memref<128x128xbf16, #tpu.memory_space<vmem>>, vector<128x128xbf16>
    %cst_14 = arith.constant dense<0.000000e+00> : vector<128x128xf32>
    %18 = tpu.matmul %16, %17, %cst_14 {dimension_numbers = #tpu.dot_dimension_numbers<[1], [0], [0], [1], [0, 0, 1, 1], [], []>} : vector<128x128xbf16>, vector<128x128xbf16>, vector<128x128xf32> -> vector<128x128xf32>
    %c0_15 = arith.constant 0 : index
    %c0_16 = arith.constant 0 : index
    %19 = vector.load %arg7[%c0_15, %c0_16] : memref<1x128xf32, #tpu.memory_space<vmem>>, vector<1x128xf32>
    %20 = vector.broadcast %19 : vector<1x128xf32> to vector<128x128xf32>
    %21 = arith.addf %18, %20 : vector<128x128xf32>
    %c0_17 = arith.constant 0 : index
    %c0_18 = arith.constant 0 : index
    %22 = vector.load %arg8[%c0_17, %c0_18] : memref<128x128xf32, #tpu.memory_space<vmem>>, vector<128x128xf32>
    tpu.vector_store %arg8[%c0_17, %c0_18], %21 {strides = array<i32>} : memref<128x128xf32, #tpu.memory_space<vmem>>, vector<128x128xf32>,
    return
  }
  func.func @transform_0(%arg0: i32) -> (i32, i32) {
    %c0_i32 = arith.constant 0 : i32
    %c0_i32_0 = arith.constant 0 : i32
    return %arg0, %c0_i32 : i32, i32
  }
  func.func @transform_1(%arg0: i32) -> (i32, i32) {
    %c0_i32 = arith.constant 0 : i32
    %c0_i32_0 = arith.constant 0 : i32
    %c0_i32_1 = arith.constant 0 : i32
    return %c0_i32, %c0_i32_0 : i32, i32
  }
  func.func @transform_2(%arg0: i32) -> (i32, i32) {
    %c0_i32 = arith.constant 0 : i32
    %c0_i32_0 = arith.constant 0 : i32
    %c0_i32_1 = arith.constant 0 : i32
    return %c0_i32, %c0_i32_0 : i32, i32
  }
  func.func @transform_3(%arg0: i32) -> (i32, i32) {
    %c0_i32 = arith.constant 0 : i32
    %c0_i32_0 = arith.constant 0 : i32
    %c0_i32_1 = arith.constant 0 : i32
    return %c0_i32, %c0_i32_0 : i32, i32
  }
  func.func @transform_4(%arg0: i32) -> (i32, i32) {
    %c0_i32 = arith.constant 0 : i32
    %c0_i32_0 = arith.constant 0 : i32
    %c0_i32_1 = arith.constant 0 : i32
    return %c0_i32, %c0_i32_0 : i32, i32
  }
  func.func @transform_5(%arg0: i32) -> (i32, i32) {
    %c0_i32 = arith.constant 0 : i32
    %c0_i32_0 = arith.constant 0 : i32
    %c0_i32_1 = arith.constant 0 : i32
    return %c0_i32, %c0_i32_0 : i32, i32
  }
  func.func @transform_6(%arg0: i32) -> (i32, i32) {
    %c0_i32 = arith.constant 0 : i32
    %c0_i32_0 = arith.constant 0 : i32
    %c0_i32_1 = arith.constant 0 : i32
    return %c0_i32, %c0_i32_0 : i32, i32
  }
  func.func @transform_7(%arg0: i32) -> (i32, i32) {
    %c0_i32 = arith.constant 0 : i32
    %c0_i32_0 = arith.constant 0 : i32
    return %arg0, %c0_i32 : i32, i32
  }
}

</mosaic_0001>

<bundles_post_ra>
// kernel: mlp_forward.1
= control target key start
LH: loop header
LB: loop body
LE: loop exit
PB: predicated region body
PF: predicated region fallthrough
CT: control target
= control target key end

     0   :  { %s1204_s1 = inlined_call_operand.vmem [shape: bf16[256,128], index: 1, kind: input, shape index: {}]   ;;  %s1205_s2 = inlined_call_operand.vmem [shape: f32[1,128], index: 2, kind: input, shape index: {}]   ;;  %s1206_s0 = inlined_call_operand.vmem [shape: bf16[128,256], index: 0, kind: input, shape index: {}]   ;;  %s1207_s3 = inlined_call_operand.vmem [shape: bf16[128,128], index: 3, kind: input, shape index: {}]   ;;  %s1208_s4 = inlined_call_operand.vmem [shape: f32[1,128], index: 4, kind: input, shape index: {}]   ;;  %s1209_s5 = inlined_call_operand.vmem [shape: bf16[128,128], index: 5, kind: input, shape index: {}]   ;;  %s1210_s6 = inlined_call_operand.vmem [shape: f32[1,128], index: 6, kind: input, shape index: {}]   ;;  %s1211_s7 = inlined_call_operand.vmem [shape: f32[128,128], index: 7, kind: output, shape index: {}]  }
   0x1   :  { %v869_v0 = vld [vmem:[%s1204_s1 + $0x38] sm:$0xff]  ;;  %v868_v2 = vld [vmem:[%s1204_s1 + $0x30] sm:$0xff]  ;;  %v867_v4 = vld [vmem:[%s1204_s1 + $0x28] sm:$0xff] }
   0x2   :  { %v877_v1 = vld [vmem:[%s1204_s1 + $0x78] sm:$0xff]  ;;  %254 = vmatpush.bf16.msra.mxu0 %v869_v0  ;;  %v876_v3 = vld [vmem:[%s1204_s1 + $0x70] sm:$0xff]  ;;  %v875_v5 = vld [vmem:[%s1204_s1 + $0x68] sm:$0xff] }
   0x3   :  { %303 = vmatpush.bf16.msra.mxu1 %v877_v1  ;;  %v866_v6 = vld [vmem:[%s1204_s1 + $0x20] sm:$0xff]  ;;  %v865_v8 = vld [vmem:[%s1204_s1 + $0x18] sm:$0xff]  ;;  %v864_v10 = vld [vmem:[%s1204_s1 + $0x10] sm:$0xff] }
   0x4   :  { %v874_v7 = vld [vmem:[%s1204_s1 + $0x60] sm:$0xff]  ;;  %v873_v9 = vld [vmem:[%s1204_s1 + $0x58] sm:$0xff]  ;;  %v872_v11 = vld [vmem:[%s1204_s1 + $0x50] sm:$0xff] }
   0x5   :  { %v863_v12 = vld [vmem:[%s1204_s1 + $0x8] sm:$0xff]  ;;  %v862_v14 = vld [vmem:[%s1204_s1] sm:$0xff]  ;;  %v664_v22 = vld [vmem:[%s1206_s0 + $0x10] sm:$0xf] }
   0x6   :  { %255 = vmatpush.bf16.msra.mxu0 %v868_v2  ;;  %v871_v13 = vld [vmem:[%s1204_s1 + $0x48] sm:$0xff]  ;;  %v870_v15 = vld [vmem:[%s1204_s1 + $0x40] sm:$0xff]  ;;  %v849_v23 = vld [vmem:[%s1206_s0 + $0x14] sm:$0xf0] }
   0x7   :  { %304 = vmatpush.bf16.msra.mxu1 %v876_v3  ;;  %v656_v16 = vld [vmem:[%s1206_s0] sm:$0xf]  ;;  %v847_v17 = vld [vmem:[%s1206_s0 + $0x4] sm:$0xf0]  ;;  %v846_v18 = vld [vmem:[%s1206_s0 + $0x4] sm:$0xf]  ;;  %v665_v26 = vor.u32 %v849_v23, %v664_v22 }
   0x8   :  { %v658_v19 = vld [vmem:[%s1206_s0 + $0x8] sm:$0xf0]  ;;  %v657_v20 = vor.u32 %v847_v17, %v656_v16  ;;  %v848_v24 = vld [vmem:[%s1206_s0 + $0x14] sm:$0xf]  ;;  %v666_v25 = vld [vmem:[%s1206_s0 + $0x18] sm:$0xf0] }
   0x9   :  { %v661_v21 = vor.u32 %v846_v18, %v658_v19  ;;  %v669_v27 = vor.u32 %v848_v24, %v666_v25  ;;  %v672_v28 = vld [vmem:[%s1206_s0 + $0x20] sm:$0xf]  ;;  %v851_v29 = vld [vmem:[%s1206_s0 + $0x24] sm:$0xf0]  ;;  %v850_v30 = vld [vmem:[%s1206_s0 + $0x24] sm:$0xf] }
   0xa   :  { %256 = vmatpush.bf16.msra.mxu0 %v867_v4  ;;  %v674_v31 = vld [vmem:[%s1206_s0 + $0x28] sm:$0xf0]  ;;  %v673_v32 = vor.u32 %v851_v29, %v672_v28  ;;  %v680_v34 = vld [vmem:[%s1206_s0 + $0x30] sm:$0xf]  ;;  %v853_v35 = vld [vmem:[%s1206_s0 + $0x34] sm:$0xf0] }
   0xb   :  { %305 = vmatpush.bf16.msra.mxu1 %v875_v5  ;;  %v677_v33 = vor.u32 %v850_v30, %v674_v31  ;;  %v852_v36 = vld [vmem:[%s1206_s0 + $0x34] sm:$0xf]  ;;  %v682_v37 = vld [vmem:[%s1206_s0 + $0x38] sm:$0xf0]  ;;  %v681_v38 = vor.u32 %v853_v35, %v680_v34  ;;  %v688_v40 = vld [vmem:[%s1206_s0 + $0x40] sm:$0xf] }
   0xc   :  { %v685_v39 = vor.u32 %v852_v36, %v682_v37  ;;  %v855_v41 = vld [vmem:[%s1206_s0 + $0x44] sm:$0xf0]  ;;  %v854_v42 = vld [vmem:[%s1206_s0 + $0x44] sm:$0xf]  ;;  %v690_v43 = vld [vmem:[%s1206_s0 + $0x48] sm:$0xf0] }
   0xd   :  { %v689_v44 = vor.u32 %v855_v41, %v688_v40  ;;  %v693_v45 = vor.u32 %v854_v42, %v690_v43  ;;  %v885_v46 = vld [vmem:[%s1207_s3 + $0x38] sm:$0xff]  ;;  %v696_v47 = vld [vmem:[%s1206_s0 + $0x50] sm:$0xf]  ;;  %v856_v49 = vld [vmem:[%s1206_s0 + $0x54] sm:$0xf] }
   0xe   :  { %257 = vmatpush.bf16.msra.mxu0 %v866_v6  ;;  %444 = vmatpush.bf16.msra.mxu2 %v885_v46  ;;  %v857_v48 = vld [vmem:[%s1206_s0 + $0x54] sm:$0xf0]  ;;  %v698_v50 = vld [vmem:[%s1206_s0 + $0x58] sm:$0xf0]  ;;  %v884_v53 = vld [vmem:[%s1207_s3 + $0x30] sm:$0xff] }
   0xf   :  { %306 = vmatpush.bf16.msra.mxu1 %v874_v7  ;;  %v697_v51 = vor.u32 %v857_v48, %v696_v47  ;;  %v701_v52 = vor.u32 %v856_v49, %v698_v50  ;;  %v883_v54 = vld [vmem:[%s1207_s3 + $0x28] sm:$0xff]  ;;  %v882_v55 = vld [vmem:[%s1207_s3 + $0x20] sm:$0xff]  ;;  %v881_v62 = vld [vmem:[%s1207_s3 + $0x18] sm:$0xff] }
  0x10   :  { %v704_v56 = vld [vmem:[%s1206_s0 + $0x60] sm:$0xf]  ;;  %v859_v57 = vld [vmem:[%s1206_s0 + $0x64] sm:$0xf0]  ;;  %v858_v58 = vld [vmem:[%s1206_s0 + $0x64] sm:$0xf] }
  0x11   :  { %v706_v59 = vld [vmem:[%s1206_s0 + $0x68] sm:$0xf0]  ;;  %v705_v60 = vor.u32 %v859_v57, %v704_v56  ;;  %v880_v63 = vld [vmem:[%s1207_s3 + $0x10] sm:$0xff]  ;;  %v861_v2 = vld [vmem:[%s1206_s0 + $0x74] sm:$0xf0] }
  0x12   :  { %258 = vmatpush.bf16.msra.mxu0 %v865_v8  ;;  %445 = vmatpush.bf16.msra.mxu2 %v884_v53  ;;  %v709_v61 = vor.u32 %v858_v58, %v706_v59  ;;  %v879_v0 = vld [vmem:[%s1207_s3 + $0x8] sm:$0xff]  ;;  %v712_v1 = vld [vmem:[%s1206_s0 + $0x70] sm:$0xf]  ;;  %v860_v3 = vld [vmem:[%s1206_s0 + $0x74] sm:$0xf] }
  0x13   :  { %307 = vmatpush.bf16.msra.mxu1 %v873_v9  ;;  %v714_v4 = vld [vmem:[%s1206_s0 + $0x78] sm:$0xf0]  ;;  %v878_v5 = vld [vmem:[%s1207_s3] sm:$0xff]  ;;  %v713_v6 = vor.u32 %v861_v2, %v712_v1 }
  0x14   :  { %v717_v7 = vor.u32 %v860_v3, %v714_v4 }
  0x16   :  { %259 = vmatpush.bf16.msra.mxu0 %v864_v10  ;;  %446 = vmatpush.bf16.msra.mxu2 %v883_v54  ;;  %v1108_v10 = vld [vmem:[%s1205_s2] ss:$0 sm:$0xff] }
  0x17   :  { %308 = vmatpush.bf16.msra.mxu1 %v872_v11 }
  0x1a   :  { %260 = vmatpush.bf16.msra.mxu0 %v863_v12  ;;  %447 = vmatpush.bf16.msra.mxu2 %v882_v55 }
  0x1b   :  { %309 = vmatpush.bf16.msra.mxu1 %v871_v13 }
  0x1e   :  { %261 = vmatpush.bf16.msra.mxu0 %v862_v14  ;;  %448 = vmatpush.bf16.msra.mxu2 %v881_v62 }
  0x1f   :  { %310 = vmatpush.bf16.msra.mxu1 %v870_v15 }
  0x21   :  { %262 = vmatmul.bf16.vlgmr.msra.gmra.mxu0 %v657_v20 }
  0x22   :  { %311 = vmatmul.bf16.vlgmr.msra.gmra.mxu1 %v661_v21  ;;  %449 = vmatpush.bf16.msra.mxu2 %v880_v63 }
  0x26   :  { %450 = vmatpush.bf16.msra.mxu2 %v879_v0 }
  0x2a   :  { %451 = vmatpush.bf16.msra.mxu2 %v878_v5 }
  0x31   :  { %267 = vmatmul.bf16.gmra.mxu0 %v665_v26 }
  0x32   :  { %316 = vmatmul.bf16.gmra.mxu1 %v669_v27 }
  0x41   :  { %272 = vmatmul.bf16.gmra.mxu0 %v673_v32 }
  0x42   :  { %321 = vmatmul.bf16.gmra.mxu1 %v677_v33 }
  0x51   :  { %277 = vmatmul.bf16.gmra.mxu0 %v681_v38 }
  0x52   :  { %326 = vmatmul.bf16.gmra.mxu1 %v685_v39 }
  0x61   :  { %282 = vmatmul.bf16.gmra.mxu0 %v689_v44 }
  0x62   :  { %331 = vmatmul.bf16.gmra.mxu1 %v693_v45 }
  0x71   :  { %287 = vmatmul.bf16.gmra.mxu0 %v697_v51 }
  0x72   :  { %336 = vmatmul.bf16.gmra.mxu1 %v701_v52 }
  0x81   :  { %292 = vmatmul.bf16.gmra.mxu0 %v705_v60 }
  0x82   :  { %341 = vmatmul.bf16.gmra.mxu1 %v709_v61 }
  0x91   :  { %297 = vmatmul.bf16.gmra.mxu0 %v713_v6 }
  0x92   :  { %346 = vmatmul.bf16.gmra.mxu1 %v717_v7 }
  0x9e   :  { %v263_v8 = vpop.f32.mrf.mxu0 }
  0x9f   :  { %v312_v9 = vpop.f32.mrf.mxu1  ;;  %v264_v11 = vadd.f32 %v1108_v10, %v263_v8 }
  0xa1   :  { %v313_v14 = vadd.f32 %v312_v9, %v264_v11 }
  0xa3   :  { %v352_v17 = vmax.f32 %v313_v14, 0.0  ;;  %v893_v14 = vld [vmem:[%s1209_s5 + $0x38] sm:$0xff] }
  0xa4   :  { %585 = vmatpush.bf16.msra.mxu3 %v893_v14 }
  0xa6   :  { %v265_v12 = vpop.f32.mrf.mxu0 }
  0xa7   :  { %v314_v13 = vpop.f32.mrf.mxu1  ;;  %v266_v15 = vadd.f32 %v1108_v10, %v265_v12 }
  0xa9   :  { %v315_v16 = vadd.f32 %v314_v13, %v266_v15  ;;  %v892_v15 = vld [vmem:[%s1209_s5 + $0x30] sm:$0xff] }
  0xaa   :  { %586 = vmatpush.bf16.msra.mxu3 %v892_v15 }
  0xab   :  { %v353_v18 = vmax.f32 %v315_v16, 0.0 }
  0xad   :  { %v368_v19 = vpack.c.bf16 %v353_v18, %v352_v17  ;;  %v891_v17 = vld [vmem:[%s1209_s5 + $0x28] sm:$0xff] }
  0xae   :  { %v268_v20 = vpop.f32.mrf.mxu0  ;;  %587 = vmatpush.bf16.msra.mxu3 %v891_v17 }
  0xaf   :  { %v317_v21 = vpop.f32.mrf.mxu1  ;;  %452 = vmatmul.bf16.vlgmr.msra.gmra.mxu2 %v368_v19  ;;  %v269_v22 = vadd.f32 %v1108_v10, %v268_v20 }
  0xb1   :  { %v318_v25 = vadd.f32 %v317_v21, %v269_v22 }
  0xb3   :  { %v354_v28 = vmax.f32 %v318_v25, 0.0 }
  0xb6   :  { %v270_v23 = vpop.f32.mrf.mxu0 }
  0xb7   :  { %v319_v24 = vpop.f32.mrf.mxu1  ;;  %v271_v26 = vadd.f32 %v1108_v10, %v270_v23  ;;  %v890_v23 = vld [vmem:[%s1209_s5 + $0x20] sm:$0xff] }
  0xb8   :  { %588 = vmatpush.bf16.msra.mxu3 %v890_v23 }
  0xb9   :  { %v320_v27 = vadd.f32 %v319_v24, %v271_v26 }
  0xbb   :  { %v355_v29 = vmax.f32 %v320_v27, 0.0 }
  0xbd   :  { %v369_v30 = vpack.c.bf16 %v355_v29, %v354_v28  ;;  %v889_v29 = vld [vmem:[%s1209_s5 + $0x18] sm:$0xff] }
  0xbe   :  { %v273_v31 = vpop.f32.mrf.mxu0  ;;  %589 = vmatpush.bf16.msra.mxu3 %v889_v29 }
  0xbf   :  { %v322_v32 = vpop.f32.mrf.mxu1  ;;  %457 = vmatmul.bf16.gmra.mxu2 %v369_v30  ;;  %v274_v33 = vadd.f32 %v1108_v10, %v273_v31  ;;  %v888_v31 = vld [vmem:[%s1209_s5 + $0x10] sm:$0xff] }
  0xc1   :  { %v323_v36 = vadd.f32 %v322_v32, %v274_v33 }
  0xc2   :  { %590 = vmatpush.bf16.msra.mxu3 %v888_v31 }
  0xc3   :  { %v356_v39 = vmax.f32 %v323_v36, 0.0  ;;  %v887_v36 = vld [vmem:[%s1209_s5 + $0x8] sm:$0xff] }
  0xc6   :  { %v275_v34 = vpop.f32.mrf.mxu0  ;;  %591 = vmatpush.bf16.msra.mxu3 %v887_v36 }
  0xc7   :  { %v324_v35 = vpop.f32.mrf.mxu1  ;;  %v276_v37 = vadd.f32 %v1108_v10, %v275_v34 }
  0xc9   :  { %v325_v38 = vadd.f32 %v324_v35, %v276_v37 }
  0xcb   :  { %v357_v40 = vmax.f32 %v325_v38, 0.0 }
  0xcd   :  { %v370_v41 = vpack.c.bf16 %v357_v40, %v356_v39  ;;  %v886_v40 = vld [vmem:[%s1209_s5] sm:$0xff] }
  0xce   :  { %v278_v42 = vpop.f32.mrf.mxu0  ;;  %592 = vmatpush.bf16.msra.mxu3 %v886_v40 }
  0xcf   :  { %v327_v43 = vpop.f32.mrf.mxu1  ;;  %462 = vmatmul.bf16.gmra.mxu2 %v370_v41  ;;  %v279_v44 = vadd.f32 %v1108_v10, %v278_v42 }
  0xd1   :  { %v328_v47 = vadd.f32 %v327_v43, %v279_v44 }
  0xd3   :  { %v358_v50 = vmax.f32 %v328_v47, 0.0 }
  0xd6   :  { %v280_v45 = vpop.f32.mrf.mxu0 }
  0xd7   :  { %v329_v46 = vpop.f32.mrf.mxu1  ;;  %v281_v48 = vadd.f32 %v1108_v10, %v280_v45 }
  0xd9   :  { %v330_v49 = vadd.f32 %v329_v46, %v281_v48 }
  0xdb   :  { %v359_v51 = vmax.f32 %v330_v49, 0.0 }
  0xdd   :  { %v371_v52 = vpack.c.bf16 %v359_v51, %v358_v50 }
  0xde   :  { %v283_v53 = vpop.f32.mrf.mxu0 }
  0xdf   :  { %v332_v54 = vpop.f32.mrf.mxu1  ;;  %467 = vmatmul.bf16.gmra.mxu2 %v371_v52  ;;  %v284_v55 = vadd.f32 %v1108_v10, %v283_v53 }
  0xe1   :  { %v333_v58 = vadd.f32 %v332_v54, %v284_v55 }
  0xe3   :  { %v360_v61 = vmax.f32 %v333_v58, 0.0 }
  0xe6   :  { %v285_v56 = vpop.f32.mrf.mxu0 }
  0xe7   :  { %v334_v57 = vpop.f32.mrf.mxu1  ;;  %v286_v59 = vadd.f32 %v1108_v10, %v285_v56 }
  0xe9   :  { %v335_v60 = vadd.f32 %v334_v57, %v286_v59 }
  0xeb   :  { %v361_v62 = vmax.f32 %v335_v60, 0.0 }
  0xed   :  { %v372_v63 = vpack.c.bf16 %v361_v62, %v360_v61 }
  0xee   :  { %v288_v0 = vpop.f32.mrf.mxu0 }
  0xef   :  { %v337_v1 = vpop.f32.mrf.mxu1  ;;  %472 = vmatmul.bf16.gmra.mxu2 %v372_v63  ;;  %v289_v2 = vadd.f32 %v1108_v10, %v288_v0 }
  0xf1   :  { %v338_v5 = vadd.f32 %v337_v1, %v289_v2 }
  0xf3   :  { %v362_v8 = vmax.f32 %v338_v5, 0.0 }
  0xf6   :  { %v290_v3 = vpop.f32.mrf.mxu0 }
  0xf7   :  { %v339_v4 = vpop.f32.mrf.mxu1  ;;  %v291_v6 = vadd.f32 %v1108_v10, %v290_v3 }
  0xf9   :  { %v340_v7 = vadd.f32 %v339_v4, %v291_v6 }
  0xfb   :  { %v363_v9 = vmax.f32 %v340_v7, 0.0 }
  0xfd   :  { %v373_v11 = vpack.c.bf16 %v363_v9, %v362_v8 }
  0xfe   :  { %v293_v12 = vpop.f32.mrf.mxu0 }
  0xff   :  { %v342_v13 = vpop.f32.mrf.mxu1  ;;  %477 = vmatmul.bf16.gmra.mxu2 %v373_v11  ;;  %v294_v16 = vadd.f32 %v1108_v10, %v293_v12 }
 0x101   :  { %v343_v20 = vadd.f32 %v342_v13, %v294_v16 }
 0x103   :  { %v364_v24 = vmax.f32 %v343_v20, 0.0 }
 0x106   :  { %v295_v18 = vpop.f32.mrf.mxu0 }
 0x107   :  { %v344_v19 = vpop.f32.mrf.mxu1  ;;  %v296_v21 = vadd.f32 %v1108_v10, %v295_v18 }
 0x109   :  { %v345_v22 = vadd.f32 %v344_v19, %v296_v21 }
 0x10b   :  { %v365_v25 = vmax.f32 %v345_v22, 0.0 }
 0x10d   :  { %v374_v26 = vpack.c.bf16 %v365_v25, %v364_v24 }
 0x10e   :  { %v298_v27 = vpop.f32.mrf.mxu0 }
 0x10f   :  { %v347_v28 = vpop.f32.mrf.mxu1  ;;  %482 = vmatmul.bf16.gmra.mxu2 %v374_v26  ;;  %v299_v30 = vadd.f32 %v1108_v10, %v298_v27 }
 0x111   :  { %v348_v33 = vadd.f32 %v347_v28, %v299_v30 }
 0x113   :  { %v366_v38 = vmax.f32 %v348_v33, 0.0 }
 0x116   :  { %v300_v32 = vpop.f32.mrf.mxu0 }
 0x117   :  { %v301_v34 = vadd.f32 %v1108_v10, %v300_v32  ;;  %v349_v35 = vpop.f32.mrf.mxu1  ;;  %v895_v10 = vld [vmem:[%s1208_s4] ss:$0 sm:$0xff] }
 0x119   :  { %v350_v37 = vadd.f32 %v349_v35, %v301_v34  ;;  %v896_v35 = vld [vmem:[%s1210_s6] ss:$0 sm:$0xff] }
 0x11b   :  { %v367_v39 = vmax.f32 %v350_v37, 0.0 }
 0x11d   :  { %v375_v41 = vpack.c.bf16 %v367_v39, %v366_v38 }
 0x11f   :  { %487 = vmatmul.bf16.gmra.mxu2 %v375_v41 }
 0x132   :  { %v453_v42 = vpop.f32.mrf.mxu2 }
 0x133   :  { %v454_v43 = vadd.f32 %v895_v10, %v453_v42 }
 0x135   :  { %v493_v46 = vmax.f32 %v454_v43, 0.0 }
 0x13a   :  { %v455_v44 = vpop.f32.mrf.mxu2 }
 0x13b   :  { %v456_v45 = vadd.f32 %v895_v10, %v455_v44 }
 0x13d   :  { %v494_v47 = vmax.f32 %v456_v45, 0.0 }
 0x13f   :  { %v509_v48 = vpack.c.bf16 %v494_v47, %v493_v46 }
 0x141   :  { %593 = vmatmul.bf16.vlgmr.msra.gmra.mxu3 %v509_v48 }
 0x142   :  { %v458_v49 = vpop.f32.mrf.mxu2 }
 0x143   :  { %v459_v50 = vadd.f32 %v895_v10, %v458_v49 }
 0x145   :  { %v495_v53 = vmax.f32 %v459_v50, 0.0 }
 0x14a   :  { %v460_v51 = vpop.f32.mrf.mxu2 }
 0x14b   :  { %v461_v52 = vadd.f32 %v895_v10, %v460_v51 }
 0x14d   :  { %v496_v54 = vmax.f32 %v461_v52, 0.0 }
 0x14f   :  { %v510_v55 = vpack.c.bf16 %v496_v54, %v495_v53 }
 0x151   :  { %598 = vmatmul.bf16.gmra.mxu3 %v510_v55 }
 0x152   :  { %v463_v56 = vpop.f32.mrf.mxu2 }
 0x153   :  { %v464_v57 = vadd.f32 %v895_v10, %v463_v56 }
 0x155   :  { %v497_v60 = vmax.f32 %v464_v57, 0.0 }
 0x15a   :  { %v465_v58 = vpop.f32.mrf.mxu2 }
 0x15b   :  { %v466_v59 = vadd.f32 %v895_v10, %v465_v58 }
 0x15d   :  { %v498_v61 = vmax.f32 %v466_v59, 0.0 }
 0x15f   :  { %v511_v62 = vpack.c.bf16 %v498_v61, %v497_v60 }
 0x161   :  { %603 = vmatmul.bf16.gmra.mxu3 %v511_v62 }
 0x162   :  { %v468_v63 = vpop.f32.mrf.mxu2 }
 0x163   :  { %v469_v0 = vadd.f32 %v895_v10, %v468_v63 }
 0x165   :  { %v499_v3 = vmax.f32 %v469_v0, 0.0 }
 0x16a   :  { %v470_v1 = vpop.f32.mrf.mxu2 }
 0x16b   :  { %v471_v2 = vadd.f32 %v895_v10, %v470_v1 }
 0x16d   :  { %v500_v4 = vmax.f32 %v471_v2, 0.0 }
 0x16f   :  { %v512_v5 = vpack.c.bf16 %v500_v4, %v499_v3 }
 0x171   :  { %608 = vmatmul.bf16.gmra.mxu3 %v512_v5 }
 0x172   :  { %v473_v6 = vpop.f32.mrf.mxu2 }
 0x173   :  { %v474_v7 = vadd.f32 %v895_v10, %v473_v6 }
 0x175   :  { %v501_v11 = vmax.f32 %v474_v7, 0.0 }
 0x17a   :  { %v475_v8 = vpop.f32.mrf.mxu2 }
 0x17b   :  { %v476_v9 = vadd.f32 %v895_v10, %v475_v8 }
 0x17d   :  { %v502_v12 = vmax.f32 %v476_v9, 0.0 }
 0x17f   :  { %v513_v13 = vpack.c.bf16 %v502_v12, %v501_v11 }
 0x181   :  { %613 = vmatmul.bf16.gmra.mxu3 %v513_v13 }
 0x182   :  { %v478_v14 = vpop.f32.mrf.mxu2 }
 0x183   :  { %v479_v15 = vadd.f32 %v895_v10, %v478_v14 }
 0x185   :  { %v503_v18 = vmax.f32 %v479_v15, 0.0 }
 0x18a   :  { %v480_v16 = vpop.f32.mrf.mxu2 }
 0x18b   :  { %v481_v17 = vadd.f32 %v895_v10, %v480_v16 }
 0x18d   :  { %v504_v19 = vmax.f32 %v481_v17, 0.0 }
 0x18f   :  { %v514_v20 = vpack.c.bf16 %v504_v19, %v503_v18 }
 0x191   :  { %618 = vmatmul.bf16.gmra.mxu3 %v514_v20 }
 0x192   :  { %v483_v21 = vpop.f32.mrf.mxu2 }
 0x193   :  { %v484_v22 = vadd.f32 %v895_v10, %v483_v21 }
 0x195   :  { %v505_v25 = vmax.f32 %v484_v22, 0.0 }
 0x19a   :  { %v485_v23 = vpop.f32.mrf.mxu2 }
 0x19b   :  { %v486_v24 = vadd.f32 %v895_v10, %v485_v23 }
 0x19d   :  { %v506_v26 = vmax.f32 %v486_v24, 0.0 }
 0x19f   :  { %v515_v27 = vpack.c.bf16 %v506_v26, %v505_v25 }
 0x1a1   :  { %623 = vmatmul.bf16.gmra.mxu3 %v515_v27 }
 0x1a2   :  { %v488_v28 = vpop.f32.mrf.mxu2 }
 0x1a3   :  { %v489_v29 = vadd.f32 %v895_v10, %v488_v28 }
 0x1a5   :  { %v507_v32 = vmax.f32 %v489_v29, 0.0 }
 0x1aa   :  { %v490_v30 = vpop.f32.mrf.mxu2 }
 0x1ab   :  { %v491_v31 = vadd.f32 %v895_v10, %v490_v30 }
 0x1ad   :  { %v508_v33 = vmax.f32 %v491_v31, 0.0 }
 0x1af   :  { %v516_v34 = vpack.c.bf16 %v508_v33, %v507_v32 }
 0x1b1   :  { %628 = vmatmul.bf16.gmra.mxu3 %v516_v34 }
 0x1c4   :  { %v594_v36 = vpop.f32.mrf.mxu3 }
 0x1c5   :  { %v595_v37 = vadd.f32 %v896_v35, %v594_v36 }
 0x1c7   :  { %634 = vst [vmem:[%s1211_s7] sm:$0xff] %v595_v37 }
 0x1cc   :  { %v596_v38 = vpop.f32.mrf.mxu3 }
 0x1cd   :  { %v597_v39 = vadd.f32 %v896_v35, %v596_v38 }
 0x1cf   :  { %635 = vst [vmem:[%s1211_s7 + $0x8] sm:$0xff] %v597_v39 }
 0x1d4   :  { %v599_v40 = vpop.f32.mrf.mxu3 }
 0x1d5   :  { %v600_v41 = vadd.f32 %v896_v35, %v599_v40 }
 0x1d7   :  { %636 = vst [vmem:[%s1211_s7 + $0x10] sm:$0xff] %v600_v41 }
 0x1dc   :  { %v601_v42 = vpop.f32.mrf.mxu3 }
 0x1dd   :  { %v602_v10 = vadd.f32 %v896_v35, %v601_v42 }
 0x1df   :  { %637 = vst [vmem:[%s1211_s7 + $0x18] sm:$0xff] %v602_v10 }
 0x1e4   :  { %v604_v43 = vpop.f32.mrf.mxu3 }
 0x1e5   :  { %v605_v44 = vadd.f32 %v896_v35, %v604_v43 }
 0x1e7   :  { %638 = vst [vmem:[%s1211_s7 + $0x20] sm:$0xff] %v605_v44 }
 0x1ec   :  { %v606_v45 = vpop.f32.mrf.mxu3 }
 0x1ed   :  { %v607_v46 = vadd.f32 %v896_v35, %v606_v45 }
 0x1ef   :  { %639 = vst [vmem:[%s1211_s7 + $0x28] sm:$0xff] %v607_v46 }
 0x1f4   :  { %v609_v47 = vpop.f32.mrf.mxu3 }
 0x1f5   :  { %v610_v48 = vadd.f32 %v896_v35, %v609_v47 }
 0x1f7   :  { %640 = vst [vmem:[%s1211_s7 + $0x30] sm:$0xff] %v610_v48 }
 0x1fc   :  { %v611_v49 = vpop.f32.mrf.mxu3 }
 0x1fd   :  { %v612_v50 = vadd.f32 %v896_v35, %v611_v49 }
 0x1ff   :  { %641 = vst [vmem:[%s1211_s7 + $0x38] sm:$0xff] %v612_v50 }
 0x204   :  { %v614_v51 = vpop.f32.mrf.mxu3 }
 0x205   :  { %v615_v52 = vadd.f32 %v896_v35, %v614_v51 }
 0x207   :  { %642 = vst [vmem:[%s1211_s7 + $0x40] sm:$0xff] %v615_v52 }
 0x20c   :  { %v616_v53 = vpop.f32.mrf.mxu3 }
 0x20d   :  { %v617_v54 = vadd.f32 %v896_v35, %v616_v53 }
 0x20f   :  { %643 = vst [vmem:[%s1211_s7 + $0x48] sm:$0xff] %v617_v54 }
 0x214   :  { %v619_v55 = vpop.f32.mrf.mxu3 }
 0x215   :  { %v620_v56 = vadd.f32 %v896_v35, %v619_v55 }
 0x217   :  { %644 = vst [vmem:[%s1211_s7 + $0x50] sm:$0xff] %v620_v56 }
 0x21c   :  { %v621_v57 = vpop.f32.mrf.mxu3 }
 0x21d   :  { %v622_v58 = vadd.f32 %v896_v35, %v621_v57 }
 0x21f   :  { %645 = vst [vmem:[%s1211_s7 + $0x58] sm:$0xff] %v622_v58 }
 0x224   :  { %v624_v59 = vpop.f32.mrf.mxu3 }
 0x225   :  { %v625_v60 = vadd.f32 %v896_v35, %v624_v59 }
 0x227   :  { %646 = vst [vmem:[%s1211_s7 + $0x60] sm:$0xff] %v625_v60 }
 0x22c   :  { %v626_v61 = vpop.f32.mrf.mxu3 }
 0x22d   :  { %v627_v62 = vadd.f32 %v896_v35, %v626_v61 }
 0x22f   :  { %647 = vst [vmem:[%s1211_s7 + $0x68] sm:$0xff] %v627_v62 }
 0x234   :  { %v629_v63 = vpop.f32.mrf.mxu3 }
 0x235   :  { %v630_v0 = vadd.f32 %v896_v35, %v629_v63 }
 0x237   :  { %648 = vst [vmem:[%s1211_s7 + $0x70] sm:$0xff] %v630_v0 }
 0x23c   :  { %v631_v1 = vpop.f32.mrf.mxu3 }
 0x23d   :  { %v632_v2 = vadd.f32 %v896_v35, %v631_v1 }
 0x23f   :  { %649 = vst [vmem:[%s1211_s7 + $0x78] sm:$0xff] %v632_v2 }

</bundles_post_ra>
